<compile_context>
chip_gen: v6e
topology: v6e:2x2x1
jax: 0.10.0
libtpu: 0.0.40
codegen_flags: <defaults>
</compile_context>

<pallas_src>
import math
import functools

import jax
import jax.numpy as jnp
from jax.experimental import pallas as pl
from jax.experimental.pallas import tpu as pltpu


# ----------------------------------------------------------------------------
# Tile-size helpers (pure Python ints, run at trace time).
# ----------------------------------------------------------------------------
def _cdiv(a, b):
    return -(-a // b)


def _round_up(x, m):
    return _cdiv(x, m) * m


def _tile_for_n_blocks(dim, n, align):
    """Tile size / padded dim when splitting `dim` into `n` aligned blocks."""
    aligned = _round_up(dim, align)
    tile = _round_up(_cdiv(aligned, n), align)
    n = _cdiv(aligned, tile)
    return tile, tile * n


def _balanced_tile(dim, max_tile, align):
    """Pick the tile from the number of tiles: padding waste is bounded by the
    alignment (16 / 128), not by the tile size."""
    aligned = _round_up(dim, align)
    n = _cdiv(aligned, max_tile)
    return _tile_for_n_blocks(dim, n, align)


# ----------------------------------------------------------------------------
# Kernels.  grid = (B-tiles, C-tiles, F-tiles); F (reduction) axis is last.
# ----------------------------------------------------------------------------
def _linear_kernel_f32out(x_ref, w_ref, b_ref, o_ref, *, compute_dtype):
    """f32 output: accumulate directly into the resident output block."""
    k = pl.program_id(2)

    @pl.when(k == 0)
    def _init():
        # Fold the bias into the accumulator init (exactly once per output tile).
        o_ref[...] = jnp.broadcast_to(b_ref[...], o_ref.shape)

    o_ref[...] += jnp.dot(x_ref[...].astype(compute_dtype),
                          w_ref[...].astype(compute_dtype),
                          preferred_element_type=jnp.float32)


def _linear_kernel_scratch(x_ref, w_ref, b_ref, o_ref, acc_ref, *, compute_dtype):
    """Non-f32 output: f32 VMEM accumulator, cast once at finalize."""
    k = pl.program_id(2)

    @pl.when(k == 0)
    def _init():
        acc_ref[...] = jnp.broadcast_to(b_ref[...], acc_ref.shape)

    acc_ref[...] += jnp.dot(x_ref[...].astype(compute_dtype),
                            w_ref[...].astype(compute_dtype),
                            preferred_element_type=jnp.float32)

    @pl.when(k == pl.num_programs(2) - 1)
    def _finalize():
        o_ref[...] = acc_ref[...].astype(o_ref.dtype)


# ----------------------------------------------------------------------------
# Wrapper.
# ----------------------------------------------------------------------------
@functools.partial(jax.jit,
                   static_argnames=("compute_dtype", "tm_max", "tn_max", "tk_max"))
def linear_classifier(x, weight_t, bias, *, compute_dtype=jnp.bfloat16,
                      tm_max=1024, tn_max=1024, tk_max=512):
    """y = x @ weight_t + bias  (== nn.Linear(x) with weight_t = weight.T).

    x:        (B, in_features)                      -- any float dtype
    weight_t: (in_features, num_classes)            -- ideally pre-stored in
                                                        compute_dtype (see init)
    bias:     (num_classes,)
    returns:  (B, num_classes), same dtype as x

    Defaults target v6e/v7x (big accumulator tile, small-ish tk).  On v5e pass
    tm_max=tn_max=512.  Use compute_dtype=jnp.float32 for full nn.Linear parity.
    """
    B, F = x.shape
    F2, C = weight_t.shape
    assert F == F2, "in_features mismatch between x and weight_t"
    assert bias.shape == (C,)
    out_dtype = x.dtype

    # Balanced tile selection (alignment: 16 sublanes for B, 128 lanes for C/F).
    tm, Bp = _balanced_tile(B, tm_max, 16)
    tn, Cp = _balanced_tile(C, tn_max, 128)
    tk, Fp = _balanced_tile(F, tk_max, 128)

    # v7x megacore: make sure at least one "parallel" grid axis has >= 2 blocks
    # whenever the problem is large enough to split, otherwise one TC idles.
    if Bp == tm and Cp == tn:
        if _round_up(C, 128) >= 2 * 128:
            tn, Cp = _tile_for_n_blocks(C, 2, 128)
        elif _round_up(B, 16) >= 2 * 16:
            tm, Bp = _tile_for_n_blocks(B, 2, 16)

    # No pre-kernel dtype cast of x / W: the cast happens inside the kernel
    # (weight is expected to already live in compute_dtype -- hoisted to init).
    xp, wp = x, weight_t
    bp = bias.astype(jnp.float32).reshape(1, C)

    # Zero-pad to tile multiples (zeros contribute nothing to the accumulator).
    if (Bp, Fp) != (B, F):
        xp = jnp.pad(xp, ((0, Bp - B), (0, Fp - F)))
    if (Fp, Cp) != (F, C):
        wp = jnp.pad(wp, ((0, Fp - F), (0, Cp - C)))
    if Cp != C:
        bp = jnp.pad(bp, ((0, 0), (0, Cp - C)))

    grid = (Bp // tm, Cp // tn, Fp // tk)

    # Accurate HBM-traffic model: x is streamed once per C-tile, W once per
    # B-tile, output written once.
    x_bytes = Bp * Fp * xp.dtype.itemsize * (Cp // tn)
    w_bytes = Fp * Cp * wp.dtype.itemsize * (Bp // tm)
    o_bytes = Bp * Cp * jnp.dtype(out_dtype).itemsize
    cost = pl.CostEstimate(flops=2 * Bp * Fp * Cp,
                           bytes_accessed=x_bytes + w_bytes + o_bytes + Cp * 4,
                           transcendentals=0)

    if out_dtype == jnp.float32:
        kernel = functools.partial(_linear_kernel_f32out, compute_dtype=compute_dtype)
        scratch_shapes = []
    else:
        kernel = functools.partial(_linear_kernel_scratch, compute_dtype=compute_dtype)
        scratch_shapes = [pltpu.VMEM((tm, tn), jnp.float32)]

    out = pl.pallas_call(
        kernel,
        out_shape=jax.ShapeDtypeStruct((Bp, Cp), out_dtype),
        grid_spec=pltpu.PrefetchScalarGridSpec(
            num_scalar_prefetch=0,
            grid=grid,
            in_specs=[
                pl.BlockSpec((tm, tk), lambda i, j, k: (i, k)),   # x tile
                pl.BlockSpec((tk, tn), lambda i, j, k: (k, j)),   # W tile
                pl.BlockSpec((1, tn), lambda i, j, k: (0, j)),    # bias tile
            ],
            out_specs=pl.BlockSpec((tm, tn), lambda i, j, k: (i, j)),
            scratch_shapes=scratch_shapes,
        ),
        compiler_params=pltpu.CompilerParams(
            dimension_semantics=("parallel", "parallel", "arbitrary"),
            vmem_limit_bytes=48 * 1024 * 1024,   # > 16/32 MiB defaults, < v7x 64 MiB
        ),
        cost_estimate=cost,
    )(xp, wp, bp)

    if (Bp, Cp) != (B, C):
        out = out[:B, :C]
    return out


def init_linear_params(key, in_features, num_classes, *, param_dtype=jnp.float32,
                       store_dtype=jnp.bfloat16):
    """nn.Linear-style init.  Weight is stored pre-transposed as (F, C) and
    already cast to the compute/store dtype so the forward path never re-casts
    it (weight traffic dominates this memory-bound head)."""
    kw, kb = jax.random.split(key)
    bound = 1.0 / math.sqrt(in_features)
    weight_t = jax.random.uniform(kw, (in_features, num_classes),
                                  minval=-bound, maxval=bound,
                                  dtype=param_dtype).astype(store_dtype)
    bias = jax.random.uniform(kb, (num_classes,),
                              minval=-bound, maxval=bound, dtype=param_dtype)
    return weight_t, bias


if __name__ == "__main__":
    key = jax.random.PRNGKey(0)
    kx, kp = jax.random.split(key)

    batch, in_features, num_classes = 8, 32, 16
    x = jax.random.normal(kx, (batch, in_features), dtype=jnp.float32)
    weight_t, bias = init_linear_params(kp, in_features, num_classes)
    w_f32 = weight_t.astype(jnp.float32)

    # 1) Default path: f32 activations, bf16 MXU compute, f32 output (no scratch).
    y = linear_classifier(x, weight_t, bias)
    jax.block_until_ready(y)
    y_ref = x.astype(jnp.bfloat16).astype(jnp.float32) @ w_f32 + bias
    assert y.shape == (batch, num_classes)
    assert y.dtype == jnp.float32
    assert jnp.allclose(y, y_ref, atol=1e-4, rtol=1e-4)

    # 2) Numerics-parity path: compute_dtype=f32 (nn.Linear semantics).
    #    Tolerance is loose enough to cover the TPU's default f32-matmul passes.
    y_f32 = linear_classifier(x, w_f32, bias, compute_dtype=jnp.float32)
    jax.block_until_ready(y_f32)
    y_ref_f32 = x @ w_f32 + bias
    assert jnp.allclose(y_f32, y_ref_f32, atol=2e-2, rtol=2e-2)

    # 3) bf16-activation path: exercises the scratch-accumulator kernel variant.
    xb = x.astype(jnp.bfloat16)
    y_bf16 = linear_classifier(xb, weight_t, bias)
    jax.block_until_ready(y_bf16)
    y_ref_bf16 = (xb.astype(jnp.float32) @ w_f32 + bias).astype(jnp.bfloat16)
    assert y_bf16.dtype == jnp.bfloat16
    assert jnp.allclose(y_bf16.astype(jnp.float32), y_ref_bf16.astype(jnp.float32),
                        atol=2e-2, rtol=2e-2)

    print("KERNEL_OK")
</pallas_src>

<mosaic_0001>
module attributes {stable_mosaic.version = 11 : i64} {
  func.func @_linear_kernel_f32out(%arg0: i32, %arg1: i32, %arg2: i32, %arg3: memref<16x128xf32, #tpu.memory_space<vmem>>, %arg4: memref<128x128xbf16, #tpu.memory_space<vmem>>, %arg5: memref<1x128xf32, #tpu.memory_space<vmem>>, %arg6: memref<16x128xf32, #tpu.memory_space<vmem>>) attributes {dimension_semantics = [#tpu.dimension_semantics<parallel>, #tpu.dimension_semantics<parallel>, #tpu.dimension_semantics<arbitrary>], iteration_bounds = array<i64: 1, 1, 1>, scalar_prefetch = 0 : i64, scratch_operands = 0 : i64, tpu.core_type = #tpu.core_type<tc>, window_params = [{transform_indices = @transform_0, window_bounds = array<i64: 16, 128>}, {transform_indices = @transform_1, window_bounds = array<i64: 128, 128>}, {transform_indices = @transform_2, window_bounds = array<i64: 1, 128>}, {transform_indices = @transform_3, window_bounds = array<i64: 16, 128>}]} {
    %c0_i32 = arith.constant 0 : i32
    %0 = arith.cmpi eq, %arg2, %c0_i32 : i32
    %1 = arith.extui %0 : i1 to i32
    %c0_i32_0 = arith.constant 0 : i32
    %2 = arith.cmpi ne, %1, %c0_i32_0 : i32
    scf.if %2 {
      %c0_8 = arith.constant 0 : index
      %c0_9 = arith.constant 0 : index
      %10 = vector.load %arg5[%c0_8, %c0_9] : memref<1x128xf32, #tpu.memory_space<vmem>>, vector<1x128xf32>
      %11 = vector.shape_cast %10 : vector<1x128xf32> to vector<1x128xf32>
      %12 = vector.broadcast %11 : vector<1x128xf32> to vector<16x128xf32>
      %c0_10 = arith.constant 0 : index
      %c0_11 = arith.constant 0 : index
      %13 = vector.load %arg6[%c0_10, %c0_11] : memref<16x128xf32, #tpu.memory_space<vmem>>, vector<16x128xf32>
      tpu.vector_store %arg6[%c0_10, %c0_11], %12 {strides = array<i32>} : memref<16x128xf32, #tpu.memory_space<vmem>>, vector<16x128xf32>,
    } else {
    }
    %c0 = arith.constant 0 : index
    %c0_1 = arith.constant 0 : index
    %3 = vector.load %arg6[%c0, %c0_1] : memref<16x128xf32, #tpu.memory_space<vmem>>, vector<16x128xf32>
    %c0_2 = arith.constant 0 : index
    %c0_3 = arith.constant 0 : index
    %4 = vector.load %arg3[%c0_2, %c0_3] : memref<16x128xf32, #tpu.memory_space<vmem>>, vector<16x128xf32>
    %5 = arith.truncf %4 : vector<16x128xf32> to vector<16x128xbf16>
    %c0_4 = arith.constant 0 : index
    %c0_5 = arith.constant 0 : index
    %6 = vector.load %arg4[%c0_4, %c0_5] : memref<128x128xbf16, #tpu.memory_space<vmem>>, vector<128x128xbf16>
    %cst = arith.constant dense<0.000000e+00> : vector<16x128xf32>
    %7 = tpu.matmul %5, %6, %cst {dimension_numbers = #tpu.dot_dimension_numbers<[1], [0], [0], [1], [0, 0, 1, 1], [], []>} : vector<16x128xbf16>, vector<128x128xbf16>, vector<16x128xf32> -> vector<16x128xf32>
    %8 = arith.addf %3, %7 : vector<16x128xf32>
    %c0_6 = arith.constant 0 : index
    %c0_7 = arith.constant 0 : index
    %9 = vector.load %arg6[%c0_6, %c0_7] : memref<16x128xf32, #tpu.memory_space<vmem>>, vector<16x128xf32>
    tpu.vector_store %arg6[%c0_6, %c0_7], %8 {strides = array<i32>} : memref<16x128xf32, #tpu.memory_space<vmem>>, vector<16x128xf32>,
    return
  }
  func.func @transform_0(%arg0: i32, %arg1: i32, %arg2: i32) -> (i32, i32) {
    %c0_i32 = arith.constant 0 : i32
    return %arg0, %arg2 : i32, i32
  }
  func.func @transform_1(%arg0: i32, %arg1: i32, %arg2: i32) -> (i32, i32) {
    %c0_i32 = arith.constant 0 : i32
    return %arg2, %arg1 : i32, i32
  }
  func.func @transform_2(%arg0: i32, %arg1: i32, %arg2: i32) -> (i32, i32) {
    %c0_i32 = arith.constant 0 : i32
    %c0_i32_0 = arith.constant 0 : i32
    return %c0_i32, %arg1 : i32, i32
  }
  func.func @transform_3(%arg0: i32, %arg1: i32, %arg2: i32) -> (i32, i32) {
    %c0_i32 = arith.constant 0 : i32
    return %arg0, %arg1 : i32, i32
  }
}

</mosaic_0001>

<bundles_post_ra>
// kernel: linear_classifier.1
= control target key start
LH: loop header
LB: loop body
LE: loop exit
PB: predicated region body
PF: predicated region fallthrough
CT: control target
= control target key end

     0   :  { %v194_v0 = vmov 0.0   ;;  %vm195_vm0 = vmmov 0   ;;  %s255_s1 = inlined_call_operand.vmem [shape: bf16[128,128], index: 1, kind: input, shape index: {}]   ;;  %s256_s0 = inlined_call_operand.vmem [shape: f32[16,128], index: 0, kind: input, shape index: {}]   ;;  %s257_s2 = inlined_call_operand.vmem [shape: f32[1,128], index: 2, kind: input, shape index: {}]   ;;  %s258_s3 = inlined_call_operand.vmem [shape: f32[16,128], index: 3, kind: output, shape index: {}]  }
   0x1   :  { %164 = vmatprep.subr.bf16.mxu0 %v194_v0  ;;  %v186_v1 = vld [vmem:[%s255_s1 + $0x38] sm:$0xff]   ;;  %180 = vmatprep.mubr.msk.bf16.mxu0 %vm195_vm0, %v194_v0  ;;  %v187_v2 = vld [vmem:[%s255_s1 + $0x30] sm:$0xff]   ;;  %v188_v3 = vld [vmem:[%s255_s1 + $0x28] sm:$0xff]  }
   0x2   :  { %165 = vmatpush3.bf16.msra.mxu0 %v186_v1  ;;  %v189_v4 = vld [vmem:[%s255_s1 + $0x20] sm:$0xff]   ;;  %v190_v5 = vld [vmem:[%s255_s1 + $0x18] sm:$0xff]   ;;  %v191_v6 = vld [vmem:[%s255_s1 + $0x10] sm:$0xff]  }
   0x3   :  { %166 = vmatprep.subr.bf16.mxu0 %v194_v0  ;;  %v192_v7 = vld [vmem:[%s255_s1 + $0x8] sm:$0xff]   ;;  %v193_v8 = vld [vmem:[%s255_s1] sm:$0xff]  }
   0x4   :  { %v30_v9 = vld [vmem:[%s256_s0] sm:$0xff]  ;;  %v31_v10 = vld [vmem:[%s256_s0 + $0x8] sm:$0xff] }
   0x5   :  { %v32_v11 = vpack.c.bf16 %v31_v10, %v30_v9  ;;  %v146_v12 = vld [vmem:[%s257_s2] ss:$0 sm:$0xff] }
   0x6   :  { %167 = vmatpush3.bf16.msra.mxu0 %v187_v2 }
   0x7   :  { %168 = vmatprep.subr.bf16.mxu0 %v194_v0 }
   0xa   :  { %169 = vmatpush3.bf16.msra.mxu0 %v188_v3 }
   0xb   :  { %170 = vmatprep.subr.bf16.mxu0 %v194_v0 }
   0xe   :  { %171 = vmatpush3.bf16.msra.mxu0 %v189_v4 }
   0xf   :  { %172 = vmatprep.subr.bf16.mxu0 %v194_v0 }
  0x12   :  { %173 = vmatpush3.bf16.msra.mxu0 %v190_v5 }
  0x13   :  { %174 = vmatprep.subr.bf16.mxu0 %v194_v0 }
  0x16   :  { %175 = vmatpush3.bf16.msra.mxu0 %v191_v6 }
  0x17   :  { %176 = vmatprep.subr.bf16.mxu0 %v194_v0 }
  0x1a   :  { %177 = vmatpush3.bf16.msra.mxu0 %v192_v7 }
  0x1b   :  { %178 = vmatprep.subr.bf16.mxu0 %v194_v0 }
  0x1e   :  { %179 = vmatpush3.bf16.msra.mxu0 %v193_v8 }
  0x21   :  { %181 = vmatmul.mubr.bf16.vlgmr.msra.gmra.mxu0 %v32_v11 }
  0xe1   :  { %v131_v13 = vpop.f32.mrf.mxu0 }
  0xe2   :  { %v138_v14 = vadd.f32 %v146_v12, %v131_v13 }
  0xe3   :  { %v182_v15 = vpop.f32.mrf.mxu0 }
  0xe4   :  { %140 = vst [vmem:[%s258_s3] sm:$0xff] %v138_v14 }
  0xe5   :  { %v134_v16 = vpop.f32.mrf.mxu0 }
  0xe6   :  { %v139_v17 = vadd.f32 %v146_v12, %v134_v16 }
  0xe7   :  { %v183_v18 = vpop.f32.mrf.mxu0 }
  0xe8   :  { %141 = vst [vmem:[%s258_s3 + $0x8] sm:$0xff] %v139_v17 }

</bundles_post_ra>
